<compile_context>
chip_gen: v7x
topology: tpu7x:2x2x1
jax: 0.10.0
libtpu: 0.0.40
codegen_flags: <defaults>
</compile_context>

<pallas_src>
import functools

import jax
import jax.numpy as jnp
from jax.experimental import pallas as pl
from jax.experimental.pallas import tpu as pltpu


def _round_up(v, m):
    return ((v + m - 1) // m) * m


# --------------------------------------------------------------------------
# Kernel
# --------------------------------------------------------------------------
def _gru_uint_kernel(x_ref, a_ref, wa_ref, wx_ref, wh1_ref, b3_ref, o_ref, *,
                     hid, hid_pad):
    """One row-tile of the GRU update.

    hid     : true hidden dim H (width of x/a/out tiles).
    hid_pad : lane-dense gate stride Hp (>= H, multiple of 128) used inside the
              fused gate matrices.
    """
    mm_dtype = wa_ref.dtype                       # f32 or bf16 (weights decide)

    x = x_ref[...]                                # (rt, H)
    a = a_ref[...]                                # (rt, H)
    x_f32 = x if x.dtype == jnp.float32 else x.astype(jnp.float32)
    x_mm = x if x.dtype == mm_dtype else x.astype(mm_dtype)
    a_mm = a if a.dtype == mm_dtype else a.astype(mm_dtype)

    # Two wide MXU matmuls + fused bias add (bias already = b*0 + b*1 per gate).
    ga = jnp.dot(a_mm, wa_ref[...],
                 preferred_element_type=jnp.float32) + b3_ref[...]   # (rt, 3Hp)
    gx = jnp.dot(x_mm, wx_ref[...],
                 preferred_element_type=jnp.float32)                 # (rt, 2Hp)

    def gate(g, k):                               # gate k occupies [k*Hp, k*Hp+H)
        return g[:, k * hid_pad: k * hid_pad + hid]

    def sigmoid1(v):                              # single EUP op per gate
        return 0.5 * jnp.tanh(0.5 * v) + 0.5

    z = sigmoid1(gate(ga, 0) + gate(gx, 0))       # (rt, H)
    r = sigmoid1(gate(ga, 1) + gate(gx, 1))       # (rt, H)

    xr = x_f32 * r
    xr_mm = xr if xr.dtype == mm_dtype else xr.astype(mm_dtype)
    h = jnp.tanh(gate(ga, 2)
                 + jnp.dot(xr_mm, wh1_ref[...],
                           preferred_element_type=jnp.float32))      # (rt, H)

    o_ref[...] = (h * z + x_f32 * (1.0 - z)).astype(o_ref.dtype)


# --------------------------------------------------------------------------
# One-time parameter preparation (hoisted out of the hot path)
# --------------------------------------------------------------------------
def prepare_params(params, *, weight_dtype=jnp.float32):
    """Transpose, fuse and lane-pad the six Linear layers.  Call once at init.

    Weights are padded only on the OUTPUT (lane) dimension to Hp = ceil128(H):
        Wa  = [Wz0^T | Wr0^T | Wh0^T]  -> (H, 3*Hp)
        Wx  = [Wz1^T | Wr1^T]          -> (H, 2*Hp)
        Wh1 =  Wh1^T                   -> (H, H)
    and the six biases are pre-summed into one (1, 3*Hp) vector, so the kernel
    issues 3 MXU matmuls (one dependent on r) instead of 6 and adds one bias.
    """
    H = params["wz0"].shape[0]
    Hp = _round_up(H, 128)                        # lane-dense gate stride
    pad_out = Hp - H

    def wt(w):                                    # (out,in) -> (in,out), pad out-dim
        return jnp.pad(w.T, ((0, 0), (0, pad_out)))

    def pb(b):
        return jnp.pad(b, (0, pad_out))

    wa = jnp.concatenate([wt(params["wz0"]),
                          wt(params["wr0"]),
                          wt(params["wh0"])], axis=1)                # (H, 3Hp)
    wx = jnp.concatenate([wt(params["wz1"]),
                          wt(params["wr1"])], axis=1)                # (H, 2Hp)
    wh1 = params["wh1"].T                                            # (H, H)

    b3 = jnp.concatenate([pb(params["bz0"] + params["bz1"]),
                          pb(params["br0"] + params["br1"]),
                          pb(params["bh0"] + params["bh1"])]
                         ).reshape(1, 3 * Hp)                        # (1, 3Hp)

    return dict(wa=wa.astype(weight_dtype),
                wx=wx.astype(weight_dtype),
                wh1=wh1.astype(weight_dtype),
                b3=b3.astype(jnp.float32),
                hid=H, hid_pad=Hp)


# --------------------------------------------------------------------------
# Wrapper
# --------------------------------------------------------------------------
def gru_uint(x, a, fused, *, row_tile=512):
    """x, a: (N, H).  fused: output of prepare_params().  Returns (N, H)."""
    N, H = x.shape
    assert a.shape == (N, H)
    assert H == fused["hid"]
    Hp = fused["hid_pad"]

    # ---- Row tile: large for a mem-bound stream; shrink for big Hp so the
    # f32 gate intermediates (rt x 3Hp etc.) stay inside VMEM.
    rt_cap = row_tile
    if Hp >= 2048:
        rt_cap = min(rt_cap, 128)
    elif Hp >= 1024:
        rt_cap = min(rt_cap, 256)

    if N <= rt_cap:
        rt = N                                    # one full-extent row block
        n_tiles = 1
        # v7x megacore: split medium-sized single tiles so both TCs get work.
        if N >= 256:
            rt = _round_up(pl.cdiv(N, 2), 8)
            n_tiles = pl.cdiv(N, rt)
    else:
        rt = _round_up(rt_cap, 8)
        n_tiles = pl.cdiv(N, rt)                  # ragged trailing block is OK

    # ---- VMEM budget: resident weights (x2 in case the compiler keeps the
    # default double buffer despite the constant index_map) + double-buffered
    # x/a/out row tiles + f32 gate intermediates + slack; clamped to the chip.
    act_bytes = jnp.dtype(x.dtype).itemsize
    w_bytes = jnp.dtype(fused["wa"].dtype).itemsize
    vmem_need = (2 * (6 * H * Hp + 3 * Hp) * w_bytes
                 + 3 * 2 * rt * H * act_bytes
                 + rt * 8 * Hp * 4
                 + (4 << 20))
    try:
        vmem_cap = int(getattr(pltpu.get_tpu_info(), "vmem_capacity_bytes",
                               64 << 20))
    except Exception:
        vmem_cap = 64 << 20                       # conservative (v7x per-TC size)
    vmem_limit = int(min(max(vmem_need, 32 << 20), vmem_cap - (8 << 20)))

    cost = pl.CostEstimate(
        flops=2 * N * H * (3 * Hp + 2 * Hp + H),
        transcendentals=3 * N * H,
        bytes_accessed=int(3 * N * H * act_bytes
                           + (6 * H * Hp + 3 * Hp) * w_bytes),
    )

    kernel = functools.partial(_gru_uint_kernel, hid=H, hid_pad=Hp)
    row_spec = pl.BlockSpec((rt, H), lambda i: (i, 0))

    def const_spec(shape):                        # VMEM-resident across the grid
        return pl.BlockSpec(shape, lambda i: (0, 0))

    return pl.pallas_call(
        kernel,
        out_shape=jax.ShapeDtypeStruct((N, H), x.dtype),
        grid_spec=pltpu.PrefetchScalarGridSpec(
            num_scalar_prefetch=0,
            grid=(n_tiles,),
            in_specs=[
                row_spec,                          # x
                row_spec,                          # a
                const_spec((H, 3 * Hp)),           # Wa
                const_spec((H, 2 * Hp)),           # Wx
                const_spec((H, H)),                # Wh1
                const_spec((1, 3 * Hp)),           # fused bias
            ],
            out_specs=pl.BlockSpec((rt, H), lambda i: (i, 0)),
        ),
        compiler_params=pltpu.CompilerParams(
            dimension_semantics=("parallel",),
            vmem_limit_bytes=vmem_limit,
        ),
        cost_estimate=cost,
    )(x, a, fused["wa"], fused["wx"], fused["wh1"], fused["b3"])


# --------------------------------------------------------------------------
# Init + pure-JAX reference (mirrors the PyTorch module)
# --------------------------------------------------------------------------
def init_params(key, hid_dim):
    """Xavier-uniform weights, zero biases (matches reset_parameters)."""
    bound = (6.0 / (hid_dim + hid_dim)) ** 0.5
    names = ("wz0", "wz1", "wr0", "wr1", "wh0", "wh1")
    keys = jax.random.split(key, len(names))
    params = {}
    for n, k in zip(names, keys):
        params[n] = jax.random.uniform(k, (hid_dim, hid_dim), jnp.float32,
                                       minval=-bound, maxval=bound)
        params["b" + n[1:]] = jnp.zeros((hid_dim,), jnp.float32)
    return params


def gru_uint_ref(x, a, params):
    def lin(rows, w, b):
        return rows @ w.T + b
    z = jax.nn.sigmoid(lin(a, params["wz0"], params["bz0"])
                       + lin(x, params["wz1"], params["bz1"]))
    r = jax.nn.sigmoid(lin(a, params["wr0"], params["br0"])
                       + lin(x, params["wr1"], params["br1"]))
    h = jnp.tanh(lin(a, params["wh0"], params["bh0"])
                 + lin(x * r, params["wh1"], params["bh1"]))
    return h * z + x * (1.0 - z)


if __name__ == "__main__":
    hid_dim = 32
    n_rows = 16                                   # e.g. a batch of graph nodes
    key = jax.random.PRNGKey(0)
    kx, ka, kp, kb = jax.random.split(key, 4)

    x = jax.random.normal(kx, (n_rows, hid_dim), jnp.float32)
    a = jax.random.normal(ka, (n_rows, hid_dim), jnp.float32)
    params = init_params(kp, hid_dim)
    # Give the biases non-zero values so the fused-bias path is actually tested
    # (the module zero-inits them, but loaded checkpoints won't).
    bkeys = jax.random.split(kb, 6)
    for i, bn in enumerate(("bz0", "bz1", "br0", "br1", "bh0", "bh1")):
        params[bn] = 0.1 * jax.random.normal(bkeys[i], (hid_dim,), jnp.float32)

    fused = prepare_params(params)                # one-time prep, off hot path
    out = jax.block_until_ready(gru_uint(x, a, fused))

    ref = gru_uint_ref(x, a, params)
    assert out.shape == ref.shape == (n_rows, hid_dim)
    assert jnp.allclose(out, ref, atol=2e-5, rtol=2e-5), "mismatch vs reference"

    print("KERNEL_OK")
</pallas_src>

<mosaic_0001>
module attributes {stable_mosaic.version = 11 : i64} {
  func.func @_gru_uint_kernel(%arg0: i32, %arg1: memref<16x32xf32, #tpu.memory_space<vmem>>, %arg2: memref<16x32xf32, #tpu.memory_space<vmem>>, %arg3: memref<32x384xf32, #tpu.memory_space<vmem>>, %arg4: memref<32x256xf32, #tpu.memory_space<vmem>>, %arg5: memref<32x32xf32, #tpu.memory_space<vmem>>, %arg6: memref<1x384xf32, #tpu.memory_space<vmem>>, %arg7: memref<16x32xf32, #tpu.memory_space<vmem>>) attributes {dimension_semantics = [#tpu.dimension_semantics<parallel>], iteration_bounds = array<i64: 1>, scalar_prefetch = 0 : i64, scratch_operands = 0 : i64, tpu.core_type = #tpu.core_type<tc>, window_params = [{transform_indices = @transform_0, window_bounds = array<i64: 16, 32>}, {transform_indices = @transform_1, window_bounds = array<i64: 16, 32>}, {pipeline_mode = #tpu.pipeline_mode<synchronous>, transform_indices = @transform_2, window_bounds = array<i64: 32, 384>}, {pipeline_mode = #tpu.pipeline_mode<synchronous>, transform_indices = @transform_3, window_bounds = array<i64: 32, 256>}, {pipeline_mode = #tpu.pipeline_mode<synchronous>, transform_indices = @transform_4, window_bounds = array<i64: 32, 32>}, {pipeline_mode = #tpu.pipeline_mode<synchronous>, transform_indices = @transform_5, window_bounds = array<i64: 1, 384>}, {transform_indices = @transform_6, window_bounds = array<i64: 16, 32>}]} {
    %c0 = arith.constant 0 : index
    %c0_0 = arith.constant 0 : index
    %0 = vector.load %arg1[%c0, %c0_0] : memref<16x32xf32, #tpu.memory_space<vmem>>, vector<16x32xf32>
    %c0_1 = arith.constant 0 : index
    %c0_2 = arith.constant 0 : index
    %1 = vector.load %arg2[%c0_1, %c0_2] : memref<16x32xf32, #tpu.memory_space<vmem>>, vector<16x32xf32>
    %c0_3 = arith.constant 0 : index
    %c0_4 = arith.constant 0 : index
    %2 = vector.load %arg3[%c0_3, %c0_4] : memref<32x384xf32, #tpu.memory_space<vmem>>, vector<32x384xf32>
    %cst = arith.constant dense<0.000000e+00> : vector<16x384xf32>
    %3 = tpu.matmul %1, %2, %cst {dimension_numbers = #tpu.dot_dimension_numbers<[1], [0], [0], [1], [0, 0, 1, 1], [], []>} : vector<16x32xf32>, vector<32x384xf32>, vector<16x384xf32> -> vector<16x384xf32>
    %c0_5 = arith.constant 0 : index
    %c0_6 = arith.constant 0 : index
    %4 = vector.load %arg6[%c0_5, %c0_6] : memref<1x384xf32, #tpu.memory_space<vmem>>, vector<1x384xf32>
    %5 = vector.broadcast %4 : vector<1x384xf32> to vector<16x384xf32>
    %6 = arith.addf %3, %5 : vector<16x384xf32>
    %c0_7 = arith.constant 0 : index
    %c0_8 = arith.constant 0 : index
    %7 = vector.load %arg4[%c0_7, %c0_8] : memref<32x256xf32, #tpu.memory_space<vmem>>, vector<32x256xf32>
    %cst_9 = arith.constant dense<0.000000e+00> : vector<16x256xf32>
    %8 = tpu.matmul %0, %7, %cst_9 {dimension_numbers = #tpu.dot_dimension_numbers<[1], [0], [0], [1], [0, 0, 1, 1], [], []>} : vector<16x32xf32>, vector<32x256xf32>, vector<16x256xf32> -> vector<16x256xf32>
    %9 = vector.extract_strided_slice %6 {offsets = [0, 0], sizes = [16, 32], strides = [1, 1]} : vector<16x384xf32> to vector<16x32xf32>
    %10 = vector.extract_strided_slice %8 {offsets = [0, 0], sizes = [16, 32], strides = [1, 1]} : vector<16x256xf32> to vector<16x32xf32>
    %11 = arith.addf %9, %10 : vector<16x32xf32>
    %cst_10 = arith.constant 5.000000e-01 : f32
    %12 = vector.broadcast %cst_10 : f32 to vector<16x32xf32>
    %13 = arith.mulf %12, %11 : vector<16x32xf32>
    %14 = math.tanh %13 : vector<16x32xf32>
    %cst_11 = arith.constant 5.000000e-01 : f32
    %15 = vector.broadcast %cst_11 : f32 to vector<16x32xf32>
    %16 = arith.mulf %15, %14 : vector<16x32xf32>
    %cst_12 = arith.constant 5.000000e-01 : f32
    %17 = vector.broadcast %cst_12 : f32 to vector<16x32xf32>
    %18 = arith.addf %16, %17 : vector<16x32xf32>
    %19 = vector.extract_strided_slice %6 {offsets = [0, 128], sizes = [16, 32], strides = [1, 1]} : vector<16x384xf32> to vector<16x32xf32>
    %20 = vector.extract_strided_slice %8 {offsets = [0, 128], sizes = [16, 32], strides = [1, 1]} : vector<16x256xf32> to vector<16x32xf32>
    %21 = arith.addf %19, %20 : vector<16x32xf32>
    %cst_13 = arith.constant 5.000000e-01 : f32
    %22 = vector.broadcast %cst_13 : f32 to vector<16x32xf32>
    %23 = arith.mulf %22, %21 : vector<16x32xf32>
    %24 = math.tanh %23 : vector<16x32xf32>
    %cst_14 = arith.constant 5.000000e-01 : f32
    %25 = vector.broadcast %cst_14 : f32 to vector<16x32xf32>
    %26 = arith.mulf %25, %24 : vector<16x32xf32>
    %cst_15 = arith.constant 5.000000e-01 : f32
    %27 = vector.broadcast %cst_15 : f32 to vector<16x32xf32>
    %28 = arith.addf %26, %27 : vector<16x32xf32>
    %29 = arith.mulf %0, %28 : vector<16x32xf32>
    %30 = vector.extract_strided_slice %6 {offsets = [0, 256], sizes = [16, 32], strides = [1, 1]} : vector<16x384xf32> to vector<16x32xf32>
    %c0_16 = arith.constant 0 : index
    %c0_17 = arith.constant 0 : index
    %31 = vector.load %arg5[%c0_16, %c0_17] : memref<32x32xf32, #tpu.memory_space<vmem>>, vector<32x32xf32>
    %cst_18 = arith.constant dense<0.000000e+00> : vector<16x32xf32>
    %32 = tpu.matmul %29, %31, %cst_18 {dimension_numbers = #tpu.dot_dimension_numbers<[1], [0], [0], [1], [0, 0, 1, 1], [], []>} : vector<16x32xf32>, vector<32x32xf32>, vector<16x32xf32> -> vector<16x32xf32>
    %33 = arith.addf %30, %32 : vector<16x32xf32>
    %34 = math.tanh %33 : vector<16x32xf32>
    %35 = arith.mulf %34, %18 : vector<16x32xf32>
    %cst_19 = arith.constant 1.000000e+00 : f32
    %36 = vector.broadcast %cst_19 : f32 to vector<16x32xf32>
    %37 = arith.subf %36, %18 : vector<16x32xf32>
    %38 = arith.mulf %0, %37 : vector<16x32xf32>
    %39 = arith.addf %35, %38 : vector<16x32xf32>
    %c0_20 = arith.constant 0 : index
    %c0_21 = arith.constant 0 : index
    %40 = vector.load %arg7[%c0_20, %c0_21] : memref<16x32xf32, #tpu.memory_space<vmem>>, vector<16x32xf32>
    tpu.vector_store %arg7[%c0_20, %c0_21], %39 {strides = array<i32>} : memref<16x32xf32, #tpu.memory_space<vmem>>, vector<16x32xf32>,
    return
  }
  func.func @transform_0(%arg0: i32) -> (i32, i32) {
    %c0_i32 = arith.constant 0 : i32
    %c0_i32_0 = arith.constant 0 : i32
    return %arg0, %c0_i32 : i32, i32
  }
  func.func @transform_1(%arg0: i32) -> (i32, i32) {
    %c0_i32 = arith.constant 0 : i32
    %c0_i32_0 = arith.constant 0 : i32
    return %arg0, %c0_i32 : i32, i32
  }
  func.func @transform_2(%arg0: i32) -> (i32, i32) {
    %c0_i32 = arith.constant 0 : i32
    %c0_i32_0 = arith.constant 0 : i32
    %c0_i32_1 = arith.constant 0 : i32
    return %c0_i32, %c0_i32_0 : i32, i32
  }
  func.func @transform_3(%arg0: i32) -> (i32, i32) {
    %c0_i32 = arith.constant 0 : i32
    %c0_i32_0 = arith.constant 0 : i32
    %c0_i32_1 = arith.constant 0 : i32
    return %c0_i32, %c0_i32_0 : i32, i32
  }
  func.func @transform_4(%arg0: i32) -> (i32, i32) {
    %c0_i32 = arith.constant 0 : i32
    %c0_i32_0 = arith.constant 0 : i32
    %c0_i32_1 = arith.constant 0 : i32
    return %c0_i32, %c0_i32_0 : i32, i32
  }
  func.func @transform_5(%arg0: i32) -> (i32, i32) {
    %c0_i32 = arith.constant 0 : i32
    %c0_i32_0 = arith.constant 0 : i32
    %c0_i32_1 = arith.constant 0 : i32
    return %c0_i32, %c0_i32_0 : i32, i32
  }
  func.func @transform_6(%arg0: i32) -> (i32, i32) {
    %c0_i32 = arith.constant 0 : i32
    %c0_i32_0 = arith.constant 0 : i32
    return %arg0, %c0_i32 : i32, i32
  }
}

</mosaic_0001>

<bundles_post_ra>
// kernel: tpu_custom_call.1
= control target key start
LH: loop header
LB: loop body
LE: loop exit
PB: predicated region body
PF: predicated region fallthrough
CT: control target
= control target key end

     0   :  { %11 = vsyncpa [#allocation3], 0  ;;  %s935_s0 = inlined_call_operand.hbm [shape: f32[16,32], index: 0, kind: input, shape index: {}]   ;;  %s936_s1 = inlined_call_operand.hbm [shape: f32[16,32], index: 1, kind: input, shape index: {}]   ;;  %s937_s2 = inlined_call_operand.hbm [shape: f32[32,384], index: 2, kind: input, shape index: {}]   ;;  %s938_s3 = inlined_call_operand.hbm [shape: f32[32,256], index: 3, kind: input, shape index: {}]   ;;  %s939_s4 = inlined_call_operand.hbm [shape: f32[32,32], index: 4, kind: input, shape index: {}]   ;;  %s940_s5 = inlined_call_operand.vmem [shape: f32[1,384], index: 5, kind: input, shape index: {}]   ;;  %s941_s6 = inlined_call_operand.hbm [shape: f32[16,32], index: 6, kind: output, shape index: {}]  }
   0x1   :  { %12 = vsyncpa [#allocation6], 0 }
   0x2   :  { %13 = vsyncpa [#allocation9], 0 }
   0x3   :  { %14 = vsyncpa [#allocation4], 0  ;;  %s766_s21 = smov [#allocation5]   ;;  %s767_s23 = smov [#allocation8]  }
   0x4   :  { %s32_s22 = sshll.u32 %s766_s21, 4  ;;  %s56_s24 = sshll.u32 %s767_s23, 4  ;;  %s33_s22 = int_to_ptr.vmem [resolvable:$true] %s32_s22  ;;  %s814_s24 = int_to_ptr.vmem [resolvable:$true] %s56_s24 }
   0x5   :  { %s626_s27 = scalar_lea.hbm %s936_s1, 256 }
   0x6   :  { %p627_p0 = scmp.ne.s32.totalorder %s936_s1, %s626_s27  ;;  %p630_p1 = scmp.lt.u32.totalorder %s626_s27, %s936_s1 }
   0x8   :  { %p632_p2 = pnand %p630_p1, %p627_p0 }
   0xa   :  { %635 = shalt.err (!%p632_p2)
}
   0xb   :  { %s636_s8 = scalar_lea.vmem %s33_s22, 256  ;;  %p641_p4 = scmp.lt.s32.totalorder %s33_s22, %s33_s22 }
   0xc   :  { %p637_p3 = scmp.ne.s32.totalorder %s33_s22, %s636_s8  ;;  %p642_p5 = scmp.lt.s32.totalorder %s636_s8, %s636_s8 }
   0xe   :  { %p643_p6 = por %p642_p5, %p641_p4 }
  0x10   :  { %p644_p7 = pnand %p643_p6, %p637_p3 }
  0x12   :  { %647 = shalt.err (!%p644_p7)
}
  0x13   :  { %s768_s9 = smov 128   ;;  %s769_s10 = smov 8  }
  0x14   :  { %38 = dma.hbm_to_vmem [thread:$0]  %s936_s1, 256, %s33_s22, [#allocation6], %s768_s9, %s768_s9, %s769_s10  }
  0x15   :  { %s648_s15 = scalar_lea.hbm %s938_s3, 1024 }
  0x16   :  { %p649_p8 = scmp.ne.s32.totalorder %s938_s3, %s648_s15  ;;  %p652_p9 = scmp.lt.u32.totalorder %s648_s15, %s938_s3 }
  0x18   :  { %p654_p10 = pnand %p652_p9, %p649_p8 }
  0x1a   :  { %657 = shalt.err (!%p654_p10)
}
  0x1b   :  { %s658_s20 = scalar_lea.vmem %s814_s24, 1024  ;;  %p663_p12 = scmp.lt.s32.totalorder %s814_s24, %s814_s24 }
  0x1c   :  { %p659_p11 = scmp.ne.s32.totalorder %s814_s24, %s658_s20  ;;  %p664_p13 = scmp.lt.s32.totalorder %s658_s20, %s658_s20 }
  0x1e   :  { %p665_p0 = por %p664_p13, %p663_p12 }
  0x20   :  { %p666_p1 = pnand %p665_p0, %p659_p11 }
  0x22   :  { %669 = shalt.err (!%p666_p1)
}
  0x23   :  { %s770_s1 = smov 256   ;;  %s771_s21 = smov 16  }
  0x24   :  { %62 = dma.hbm_to_vmem [thread:$0]  %s938_s3, 1024, %s814_s24, [#allocation9], %s770_s1, %s770_s1, %s771_s21  }
  0x25   :  { %s772_s25 = smov [#allocation2]   ;;  %s773_s27 = smov [#allocation7]  }
  0x26   :  { %s20_s26 = sshll.u32 %s772_s25, 4  ;;  %s44_s28 = sshll.u32 %s773_s27, 4  ;;  %s21_s26 = int_to_ptr.vmem [resolvable:$true] %s20_s26  ;;  %s848_s28 = int_to_ptr.vmem [resolvable:$true] %s44_s28 }
  0x27   :  { %s670_s7 = scalar_lea.hbm %s935_s0, 256 }
  0x28   :  { %p671_p2 = scmp.ne.s32.totalorder %s935_s0, %s670_s7  ;;  %p674_p3 = scmp.lt.u32.totalorder %s670_s7, %s935_s0 }
  0x2a   :  { %p676_p4 = pnand %p674_p3, %p671_p2 }
  0x2c   :  { %679 = shalt.err (!%p676_p4)
}
  0x2d   :  { %s680_s3 = scalar_lea.vmem %s21_s26, 256  ;;  %p685_p6 = scmp.lt.s32.totalorder %s21_s26, %s21_s26 }
  0x2e   :  { %p681_p5 = scmp.ne.s32.totalorder %s21_s26, %s680_s3  ;;  %p686_p7 = scmp.lt.s32.totalorder %s680_s3, %s680_s3 }
  0x30   :  { %p687_p8 = por %p686_p7, %p685_p6 }
  0x32   :  { %p688_p9 = pnand %p687_p8, %p681_p5 }
  0x34   :  { %691 = shalt.err (!%p688_p9)
}
  0x35   :  { %26 = dma.hbm_to_vmem [thread:$0]  %s935_s0, 256, %s21_s26, [#allocation3], %s768_s9, %s768_s9, %s769_s10  }
  0x36   :  { %s692_s17 = scalar_lea.hbm %s937_s2, 1536 }
  0x37   :  { %p693_p10 = scmp.ne.s32.totalorder %s937_s2, %s692_s17  ;;  %p696_p11 = scmp.lt.u32.totalorder %s692_s17, %s937_s2 }
  0x39   :  { %p698_p12 = pnand %p696_p11, %p693_p10 }
  0x3b   :  { %701 = shalt.err (!%p698_p12)
}
  0x3c   :  { %s702_s21 = scalar_lea.vmem %s848_s28, 1536  ;;  %p707_p0 = scmp.lt.s32.totalorder %s848_s28, %s848_s28 }
  0x3d   :  { %p703_p13 = scmp.ne.s32.totalorder %s848_s28, %s702_s21  ;;  %p708_p1 = scmp.lt.s32.totalorder %s702_s21, %s702_s21 }
  0x3f   :  { %p709_p2 = por %p708_p1, %p707_p0 }
  0x41   :  { %p710_p3 = pnand %p709_p2, %p703_p13 }
  0x43   :  { %713 = shalt.err (!%p710_p3)
}
  0x44   :  { %s774_s0 = smov 384   ;;  %s775_s22 = smov 24  }
  0x45   :  { %50 = dma.hbm_to_vmem [thread:$0]  %s937_s2, 1536, %s848_s28, [#allocation6], %s774_s0, %s774_s0, %s775_s22  }
  0x46   :  { %s776_s26 = smov [#allocation10]   ;;  %s714_s7 = scalar_lea.hbm %s939_s4, 512 }
  0x47   :  { %s68_s27 = sshll.u32 %s776_s26, 4  ;;  %p715_p4 = scmp.ne.s32.totalorder %s939_s4, %s714_s7  ;;  %s69_s27 = int_to_ptr.vmem [resolvable:$true] %s68_s27 }
  0x48   :  { %p718_p5 = scmp.lt.u32.totalorder %s714_s7, %s939_s4 }
  0x4a   :  { %p720_p6 = pnand %p718_p5, %p715_p4 }
  0x4c   :  { %723 = shalt.err (!%p720_p6)
}
  0x4d   :  { %s724_s3 = scalar_lea.vmem %s69_s27, 512  ;;  %p729_p8 = scmp.lt.s32.totalorder %s69_s27, %s69_s27 }
  0x4e   :  { %p725_p7 = scmp.ne.s32.totalorder %s69_s27, %s724_s3  ;;  %p730_p9 = scmp.lt.s32.totalorder %s724_s3, %s724_s3 }
  0x50   :  { %p731_p10 = por %p730_p9, %p729_p8 }
  0x52   :  { %p732_p11 = pnand %p731_p10, %p725_p7 }
  0x54   :  { %735 = shalt.err (!%p732_p11)
}
  0x55   :  { %74 = dma.hbm_to_vmem [thread:$0]  %s939_s4, 512, %s69_s27, [#allocation9], %s768_s9, %s768_s9, %s769_s10  }
  0x56   :  { %758 = dma.done.wait [#allocation3], 256  }
  0x57   :  { %759 = vsyncadd [#allocation3], 4294967040 }
  0x58   :  { %760 = dma.done.wait [#allocation6], 1792  }
  0x59   :  { %761 = vsyncadd [#allocation6], 4294965504 }
  0x5a   :  { %762 = dma.done.wait [#allocation9], 1536  }
  0x5b   :  { %763 = vsyncadd [#allocation9], 4294965760  ;;  %v777_v0 = vmov 0.0   ;;  %v97_v1 = vld [vmem:[#allocation7 + $0x8] sm:$0xff]  ;;  %v100_v2 = vld [vmem:[#allocation7 + $0x20] sm:$0xff]  ;;  %vm125_vm0 = vcmask 261120   ;;  %v110_v41 = vlaneseq }
  0x5c   :  { %196 = vmatprep.mubr.f32.mxu0 %v777_v0  ;;  %v96_v3 = vld [vmem:[#allocation7] sm:$0xff]  ;;  %v557_v4 = vpack.c.bf16 %v100_v2, %v97_v1  ;;  %v99_v5 = vld [vmem:[#allocation7 + $0x18] sm:$0xff]  ;;  %v106_v7 = vld [vmem:[#allocation7 + $0x50] sm:$0xff] }
  0x5d   :  { %v103_v6 = vld [vmem:[#allocation7 + $0x38] sm:$0xff]  ;;  %v559_v8 = vpack.c.bf16 %v99_v5, %v96_v3  ;;  %v102_v10 = vld [vmem:[#allocation7 + $0x30] sm:$0xff]  ;;  %v105_v11 = vld [vmem:[#allocation7 + $0x48] sm:$0xff]  ;;  %v111_v42 = vshrl.u32 %v110_v41, 7 }
  0x5e   :  { %v561_v9 = vpack.c.bf16 %v106_v7, %v103_v6  ;;  %v94_v12 = vld [vmem:[#allocation5] sm:$0xff]  ;;  %558 = vmatprep.subr.bf16.mxu0 %v557_v4  ;;  %v285_v13 = vld [vmem:[#allocation8 + $0x8] sm:$0xff]  ;;  %v287_v14 = vld [vmem:[#allocation8 + $0x18] sm:$0xff]  ;;  %v563_v15 = vpack.c.bf16 %v105_v11, %v102_v10 }
  0x5f   :  { %543 = vmatprep.mubr.msk.f32.mxu1 %vm125_vm0, %v94_v12  ;;  %560 = vmatpush1.bf16.msra.mxu0 %v559_v8  ;;  %v573_v16 = vpack.c.bf16 %v287_v14, %v285_v13  ;;  %v284_v17 = vld [vmem:[#allocation8] sm:$0xff]  ;;  %v286_v18 = vld [vmem:[#allocation8 + $0x10] sm:$0xff]  ;;  %v289_v19 = vld [vmem:[#allocation8 + $0x28] sm:$0xff]  ;;  %v116_v43 = vsub.s32 1, %v111_v42  ;;  %v112_v62 = vsub.s32 0, %v111_v42  ;;  %v120_v4 = vsub.s32 2, %v111_v42 }
  0x60   :  { %562 = vmatprep.subr.bf16.mxu0 %v561_v9  ;;  %v291_v20 = vld [vmem:[#allocation8 + $0x38] sm:$0xff]  ;;  %v575_v21 = vpack.c.bf16 %v286_v18, %v284_v17  ;;  %v288_v23 = vld [vmem:[#allocation8 + $0x20] sm:$0xff]  ;;  %v290_v24 = vld [vmem:[#allocation8 + $0x30] sm:$0xff] }
  0x61   :  { %v577_v22 = vpack.c.bf16 %v291_v20, %v289_v19  ;;  %v95_v25 = vld [vmem:[#allocation5 + $0x8] sm:$0xff]  ;;  %v579_v26 = vpack.c.bf16 %v290_v24, %v288_v23  ;;  %v900_v27 = vld [vmem:[#allocation2] sm:$0xff]  ;;  %v904_v28 = vld [vmem:[#allocation2 + $0x8] sm:$0xff] }
  0x62   :  { %v98_v29 = vld [vmem:[#allocation7 + $0x10] sm:$0xff]  ;;  %v101_v30 = vld [vmem:[#allocation7 + $0x28] sm:$0xff]  ;;  %v104_v32 = vld [vmem:[#allocation7 + $0x40] sm:$0xff] }
  0x63   :  { %564 = vmatpush1.bf16.msra.mxu0 %v563_v15  ;;  %v565_v31 = vpack.c.bf16 %v101_v30, %v98_v29  ;;  %v107_v33 = vld [vmem:[#allocation7 + $0x58] sm:$0xff]  ;;  %v397_v35 = vld [vmem:[#allocation10] sm:$0xff]  ;;  %v398_v36 = vld [vmem:[#allocation10 + $0x8] sm:$0xff] }
  0x64   :  { %574 = vmatprep.subr.bf16.mxu0 %v573_v16  ;;  %v569_v34 = vpack.c.bf16 %v107_v33, %v104_v32  ;;  %v581_v37 = vpack.c.bf16 %v398_v36, %v397_v35  ;;  %v399_v38 = vld [vmem:[#allocation10 + $0x10] sm:$0xff]  ;;  %v400_v39 = vld [vmem:[#allocation10 + $0x18] sm:$0xff]  ;;  %v108_v44 = vld [vmem:[%s940_s5] sm:$0x7]  ;;  %s778_s5 = smov [#allocation11]  }
  0x65   :  { %566 = vmatprep.subr.bf16.mxu1 %v565_v31  ;;  %v585_v40 = vpack.c.bf16 %v400_v39, %v399_v38  ;;  %v117_v45 = vrot.slane %v108_v44, %v116_v43  ;;  %v113_v63 = vrot.slane %v108_v44, %v112_v62  ;;  %v121_v5 = vrot.slane %v108_v44, %v120_v4  ;;  %s501_s14 = sshll.u32 %s778_s5, 4  ;;  %s502_s14 = int_to_ptr.vmem [resolvable:$true] %s501_s14 }
  0x66   :  { %515 = vmatmul.mubr.msk.f32.vlgmr.msra.gmra.mrb[0].mxu0 %vm125_vm0, %v94_v12  ;;  %568 = vmatpush3.bf16.msra.mxu1 %v565_v31  ;;  %s736_s15 = scalar_lea.vmem %s502_s14, 256  ;;  %p741_p13 = scmp.lt.s32.totalorder %s502_s14, %s502_s14 }
  0x67   :  { %576 = vmatpush1.bf16.msra.mxu0 %v575_v21  ;;  %202 = vmatprep.mubr.f32.mxu0 %v777_v0  ;;  %p737_p12 = scmp.ne.s32.totalorder %s502_s14, %s736_s15  ;;  %p742_p0 = scmp.lt.s32.totalorder %s736_s15, %s736_s15 }
  0x68   :  { %578 = vmatprep.subr.bf16.mxu0 %v577_v22  ;;  %570 = vmatprep.subr.bf16.mxu1 %v569_v34 }
  0x69   :  { %p743_p1 = por %p742_p0, %p741_p13 }
  0x6a   :  { %516 = vmatmul.mubr.msk.f32.gmra.mrb[2].mxu0 %vm125_vm0, %v95_v25  ;;  %572 = vmatpush3.bf16.msra.mxu1 %v569_v34 }
  0x6b   :  { %580 = vmatpush1.bf16.msra.mxu0 %v579_v26  ;;  %362 = vmatprep.mubr.f32.mxu0 %v777_v0  ;;  %p744_p2 = pnand %p743_p1, %p737_p12 }
  0x6c   :  { %582 = vmatprep.subr.bf16.mxu1 %v581_v37 }
  0x6d   :  { %544 = vmatmul.mubr.msk.f32.vlgmr.msra.gmra.mrb[0].mxu1 %vm125_vm0, %v95_v25 }
  0x6e   :  { %519 = vmatmul.mubr.msk.f32.vlgmr.msra.gmra.mrb[0].mxu0 %vm125_vm0, %v900_v27  ;;  %584 = vmatpush3.bf16.msra.mxu1 %v581_v37 }
  0x6f   :  { %368 = vmatprep.mubr.f32.mxu0 %v777_v0  ;;  %586 = vmatprep.subr.bf16.mxu1 %v585_v40 }
  0x72   :  { %520 = vmatmul.mubr.msk.f32.gmra.mrb[2].mxu0 %vm125_vm0, %v904_v28  ;;  %588 = vmatpush3.bf16.msra.mxu1 %v585_v40 }
 0x141   :  { %v364_v46 = vpop.f32.mrb[0].mxu0 }
 0x142   :  { %v366_v47 = vpop.f32.mrb[1].mxu0  ;;  %v589_v1 = vadd.f32 %v364_v46, %v113_v63 }
 0x143   :  { %v590_v48 = vadd.f32 %v366_v47, %v117_v45 }
 0x144   :  { %v377_v3 = vmul.f32 0.5, %v589_v1 }
 0x145   :  { %v387_v49 = vmul.f32 0.5, %v590_v48  ;;  %v370_v50 = vpop.f32.mrb[2].mxu0 }
 0x146   :  { %v372_v51 = vpop.f32.mrb[3].mxu0  ;;  %v591_v0 = vadd.f32 %v370_v50, %v113_v63 }
 0x147   :  { %614 = vtanh.f32 %v387_v49  ;;  %v592_v52 = vadd.f32 %v372_v51, %v117_v45 }
 0x148   :  { %v378_v2 = vmul.f32 0.5, %v591_v0 }
 0x149   :  { %v388_v53 = vmul.f32 0.5, %v592_v52 }
 0x14b   :  { %616 = vtanh.f32 %v388_v53 }
 0x14c   :  { %618 = vtanh.f32 %v378_v2 }
 0x14d   :  { %620 = vtanh.f32 %v377_v3 }
 0x151   :  { %v615_v54 = vpop.eup %614 }
 0x152   :  { %v391_v55 = vmul.f32 0.5, %v615_v54 }
 0x154   :  { %v393_v56 = vadd.f32 0.5, %v391_v55 }
 0x155   :  { %v617_v57 = vpop.eup %616 }
 0x156   :  { %v395_v58 = vmul.f32 %v393_v56, %v900_v27  ;;  %v392_v59 = vmul.f32 0.5, %v617_v57  ;;  %v619_v6 = vpop.eup %618 }
 0x157   :  { %v621_v7 = vpop.eup %620  ;;  %v382_v11 = vmul.f32 0.5, %v619_v6 }
 0x158   :  { %v394_v60 = vadd.f32 0.5, %v392_v59  ;;  %554 = vmatprep.mubr.msk.f32.mxu1 %vm125_vm0, %v395_v58  ;;  %v381_v13 = vmul.f32 0.5, %v621_v7 }
 0x159   :  { %v384_v14 = vadd.f32 0.5, %v382_v11 }
 0x15a   :  { %v396_v61 = vmul.f32 %v394_v60, %v904_v28  ;;  %v383_v15 = vadd.f32 0.5, %v381_v13 }
 0x15b   :  { %v489_v16 = vsub.f32 1.0, %v384_v14 }
 0x15c   :  { %555 = vmatmul.mubr.msk.f32.vlgmr.msra.gmra.mrb[0].mxu1 %vm125_vm0, %v396_v61  ;;  %v488_v17 = vsub.f32 1.0, %v383_v15 }
 0x15d   :  { %v491_v20 = vmul.f32 %v489_v16, %v904_v28 }
 0x15e   :  { %v490_v22 = vmul.f32 %v488_v17, %v900_v27 }
 0x22f   :  { %v556_v8 = vpop.f32.mrb[0].mxu1 }
 0x230   :  { %v593_v9 = vadd.f32 %v556_v8, %v121_v5  ;;  %v473_v10 = vpop.f32.mrb[1].mxu1 }
 0x231   :  { %v594_v12 = vadd.f32 %v473_v10, %v121_v5 }
 0x232   :  { %622 = vtanh.f32 %v593_v9 }
 0x233   :  { %624 = vtanh.f32 %v594_v12 }
 0x23c   :  { %v623_v18 = vpop.eup %622 }
 0x23d   :  { %v625_v19 = vpop.eup %624  ;;  %v487_v21 = vmul.f32 %v623_v18, %v384_v14 }
 0x23e   :  { %v486_v23 = vmul.f32 %v625_v19, %v383_v15 }
 0x23f   :  { %v493_v24 = vadd.f32 %v491_v20, %v487_v21 }
 0x240   :  { %v492_v25 = vadd.f32 %v490_v22, %v486_v23 }
 0x241   :  { %495 = vst.msk [vmem:[#allocation11 + $0x8] sm:$0xff] %vm125_vm0, %v493_v24 }
 0x242   :  { %494 = vst.msk [vmem:[#allocation11] sm:$0xff] %vm125_vm0, %v492_v25 }
 0x243   :  { %747 = shalt.err (!%p744_p2)
}
 0x244   :  { %s748_s18 = scalar_lea.hbm %s941_s6, 256 }
 0x245   :  { %p749_p3 = scmp.ne.s32.totalorder %s941_s6, %s748_s18  ;;  %p752_p4 = scmp.lt.u32.totalorder %s748_s18, %s941_s6 }
 0x247   :  { %p754_p5 = pnand %p752_p4, %p749_p3 }
 0x249   :  { %757 = shalt.err (!%p754_p5)
}
 0x24a   :  { %507 = dma.vmem_to_hbm [thread:$0]  %s502_s14, 256, %s941_s6, [#allocation4], %s768_s9, %s768_s9, %s769_s10  }
 0x24b   :  { %764 = dma.done.wait [#allocation4], 256  }
 0x24c   :  { %765 = vsyncadd [#allocation4], 4294967040 }
 0x24d   :  { %511 = vsyncpa [#allocation3], 1 }
 0x24e   :  { %512 = vsyncpa [#allocation6], 1 }
 0x24f   :  { %513 = vsyncpa [#allocation9], 1 }
 0x250   :  { %514 = vsyncpa [#allocation4], 1 }

</bundles_post_ra>
